<compile_context>
chip_gen: v7x
topology: tpu7x:2x2x1
jax: 0.10.0
libtpu: 0.0.40
codegen_flags: <defaults>
</compile_context>

<pallas_src>
import jax
import jax.numpy as jnp
from jax.experimental import pallas as pl
from jax.experimental.pallas import tpu as pltpu


def _round_up(v, m):
    return (v + m - 1) // m * m


# ----------------------------------------------------------------------------
# Kernel
# ----------------------------------------------------------------------------
def ae_kernel(x_ref,
              we1, be1, we2, be2, we3, be3, wz, bz,
              wd1, bd1, wd2, bd2, wd3, bd3, wx, bx,
              xbar_ref, z_ref):
    cdt = we1.dtype  # MXU operand dtype (bf16)

    def lin(h, w_ref, b_ref, relu):
        # h: (tile_n, in) ; w_ref: (in, out) cdt ; b_ref: (1, out) f32
        y = jnp.dot(h.astype(cdt), w_ref[...],
                    preferred_element_type=jnp.float32) + b_ref[...]
        return jnp.maximum(y, 0.0) if relu else y

    h = x_ref[...]
    # encoder
    h = lin(h, we1, be1, True)
    h = lin(h, we2, be2, True)
    h = lin(h, we3, be3, True)
    z = lin(h, wz, bz, False)                 # z_layer (no activation)
    # store z immediately -> shortest possible live range for the f32 z tile
    z_ref[...] = z.astype(z_ref.dtype)
    # decoder
    h = lin(z, wd1, bd1, True)
    h = lin(h, wd2, bd2, True)
    h = lin(h, wd3, bd3, True)
    xbar_ref[...] = lin(h, wx, bx, False).astype(xbar_ref.dtype)


# ----------------------------------------------------------------------------
# One-time parameter preprocessing (hoisted out of the forward pass)
# ----------------------------------------------------------------------------
def prepare_params(params, compute_dtype=jnp.bfloat16):
    """params: list of 8 (W, b) in PyTorch Linear layout W=(out_f, in_f), in
    order enc_1, enc_2, enc_3, z_layer, dec_1, dec_2, dec_3, x_bar_layer.

    Returns a flat list [W1, b1, ..., W8, b8] where weights are transposed to
    (in, out), zero-padded so that only the *hidden* activation widths are
    multiples of 128 (the n_input and n_z boundaries stay unpadded), cast to
    `compute_dtype`; biases are f32 (1, out) rows."""
    n_layers = len(params)
    # activation width at each layer boundary
    widths = [params[0][0].shape[1]]                      # n_input (unpadded)
    for i, (w, _) in enumerate(params):
        out_f = w.shape[0]
        keep = (i == n_layers - 1) or (i == n_layers // 2 - 1)  # x_bar / z
        widths.append(out_f if keep else _round_up(out_f, 128))

    flat = []
    for i, (w, b) in enumerate(params):
        out_f, in_f = w.shape
        in_p, out_p = widths[i], widths[i + 1]
        wt = jnp.zeros((in_p, out_p), compute_dtype)
        wt = wt.at[:in_f, :out_f].set(jnp.asarray(w).T.astype(compute_dtype))
        bp = jnp.zeros((1, out_p), jnp.float32)
        bp = bp.at[0, :out_f].set(jnp.asarray(b).astype(jnp.float32))
        flat += [wt, bp]
    return flat


# ----------------------------------------------------------------------------
# Forward wrapper
# ----------------------------------------------------------------------------
def ae_forward(x, prepared, *, tile_n=None, compute_dtype=jnp.bfloat16):
    """x: (n, n_input) f32. prepared: output of prepare_params.
    Returns (x_bar, z) in float32 with the original (unpadded) shapes."""
    n, n_input = x.shape
    assert prepared[0].shape[0] == n_input, "input width mismatch"
    n_z = prepared[6].shape[1]            # z_layer weight is (in_p, n_z)

    # ---- batch tiling: big tiles, >=2 grid steps when batch allows (v7x) ----
    if tile_n is None:
        n16 = _round_up(max(n, 16), 16)
        if n16 <= 32:
            tile_n = n16                                   # single small step
        else:
            tile_n = min(1024, _round_up((n16 + 1) // 2, 16))
    n_pad = _round_up(n, tile_n)
    grid_n = n_pad // tile_n

    xc = x.astype(compute_dtype)
    if n_pad != n:
        xc = jnp.pad(xc, ((0, n_pad - n), (0, 0)))

    in_specs = [pl.BlockSpec((tile_n, n_input), lambda i: (i, 0))]
    for p in prepared:
        # full, constant-index blocks: VMEM-resident across all grid steps
        in_specs.append(pl.BlockSpec(p.shape, lambda i: (0, 0)))

    out_shape = (
        jax.ShapeDtypeStruct((n_pad, n_input), jnp.float32),  # x_bar
        jax.ShapeDtypeStruct((n_pad, n_z), jnp.float32),      # z
    )
    out_specs = (
        pl.BlockSpec((tile_n, n_input), lambda i: (i, 0)),
        pl.BlockSpec((tile_n, n_z), lambda i: (i, 0)),
    )

    x_bar, z = pl.pallas_call(
        ae_kernel,
        out_shape=out_shape,
        grid_spec=pltpu.PrefetchScalarGridSpec(
            num_scalar_prefetch=0,
            grid=(grid_n,),
            in_specs=in_specs,
            out_specs=out_specs,
        ),
        compiler_params=pltpu.CompilerParams(
            dimension_semantics=("parallel",)),
    )(xc, *prepared)

    if n_pad != n:   # feature dims already exact -> batch slice only if needed
        x_bar, z = x_bar[:n], z[:n]
    return x_bar, z


# ----------------------------------------------------------------------------
# Reference + test harness
# ----------------------------------------------------------------------------
def init_linear(key, in_f, out_f):
    # deterministic init mimicking PyTorch Linear default (U[-1/sqrt(fan_in), ..])
    kw, kb = jax.random.split(key)
    bound = 1.0 / jnp.sqrt(in_f)
    w = jax.random.uniform(kw, (out_f, in_f), jnp.float32, -bound, bound)
    b = jax.random.uniform(kb, (out_f,), jnp.float32, -bound, bound)
    return w, b


def reference_forward(x, params, compute_dtype=jnp.bfloat16):
    # Mirrors kernel numerics: bf16 MXU operands, f32 accumulation/bias.
    def lin(h, w, b, relu):
        y = jnp.dot(h.astype(compute_dtype), w.T.astype(compute_dtype),
                    preferred_element_type=jnp.float32) + b
        return jnp.maximum(y, 0.0) if relu else y
    h = x
    h = lin(h, *params[0], True)
    h = lin(h, *params[1], True)
    h = lin(h, *params[2], True)
    z = lin(h, *params[3], False)
    h = lin(z, *params[4], True)
    h = lin(h, *params[5], True)
    h = lin(h, *params[6], True)
    x_bar = lin(h, *params[7], False)
    return x_bar, z


if __name__ == "__main__":
    # small shapes consistent with the module's forward
    n_input = 32
    n_enc_1, n_enc_2, n_enc_3 = 64, 64, 32
    n_z = 16
    n_dec_1, n_dec_2, n_dec_3 = 32, 64, 64
    batch = 16

    key = jax.random.PRNGKey(0)
    keys = jax.random.split(key, 9)

    layer_dims = [
        (n_input, n_enc_1), (n_enc_1, n_enc_2), (n_enc_2, n_enc_3),
        (n_enc_3, n_z),
        (n_z, n_dec_1), (n_dec_1, n_dec_2), (n_dec_2, n_dec_3),
        (n_dec_3, n_input),
    ]
    params = [init_linear(k, i, o) for k, (i, o) in zip(keys[:8], layer_dims)]
    x = jax.random.normal(keys[8], (batch, n_input), jnp.float32)

    # one-time weight prep (transpose / pad / cast), reused across forwards
    prepared = prepare_params(params)
    jax.block_until_ready(prepared)

    x_bar, z = ae_forward(x, prepared)
    jax.block_until_ready((x_bar, z))

    assert x_bar.shape == (batch, n_input)
    assert z.shape == (batch, n_z)

    # sanity check against a plain-JAX reference using the same bf16 weights
    x_bar_ref, z_ref = reference_forward(x, params)
    assert jnp.allclose(x_bar, x_bar_ref, atol=1e-2, rtol=1e-2)
    assert jnp.allclose(z, z_ref, atol=1e-2, rtol=1e-2)

    print("KERNEL_OK")
</pallas_src>

<mosaic_0001>
module attributes {stable_mosaic.version = 11 : i64} {
  func.func @ae_kernel(%arg0: i32, %arg1: memref<16x32xbf16, #tpu.memory_space<vmem>>, %arg2: memref<32x128xbf16, #tpu.memory_space<vmem>>, %arg3: memref<1x128xf32, #tpu.memory_space<vmem>>, %arg4: memref<128x128xbf16, #tpu.memory_space<vmem>>, %arg5: memref<1x128xf32, #tpu.memory_space<vmem>>, %arg6: memref<128x128xbf16, #tpu.memory_space<vmem>>, %arg7: memref<1x128xf32, #tpu.memory_space<vmem>>, %arg8: memref<128x16xbf16, #tpu.memory_space<vmem>>, %arg9: memref<1x16xf32, #tpu.memory_space<vmem>>, %arg10: memref<16x128xbf16, #tpu.memory_space<vmem>>, %arg11: memref<1x128xf32, #tpu.memory_space<vmem>>, %arg12: memref<128x128xbf16, #tpu.memory_space<vmem>>, %arg13: memref<1x128xf32, #tpu.memory_space<vmem>>, %arg14: memref<128x128xbf16, #tpu.memory_space<vmem>>, %arg15: memref<1x128xf32, #tpu.memory_space<vmem>>, %arg16: memref<128x32xbf16, #tpu.memory_space<vmem>>, %arg17: memref<1x32xf32, #tpu.memory_space<vmem>>, %arg18: memref<16x32xf32, #tpu.memory_space<vmem>>, %arg19: memref<16x16xf32, #tpu.memory_space<vmem>>) attributes {dimension_semantics = [#tpu.dimension_semantics<parallel>], iteration_bounds = array<i64: 1>, scalar_prefetch = 0 : i64, scratch_operands = 0 : i64, tpu.core_type = #tpu.core_type<tc>, window_params = [{transform_indices = @transform_0, window_bounds = array<i64: 16, 32>}, {pipeline_mode = #tpu.pipeline_mode<synchronous>, transform_indices = @transform_1, window_bounds = array<i64: 32, 128>}, {pipeline_mode = #tpu.pipeline_mode<synchronous>, transform_indices = @transform_2, window_bounds = array<i64: 1, 128>}, {pipeline_mode = #tpu.pipeline_mode<synchronous>, transform_indices = @transform_3, window_bounds = array<i64: 128, 128>}, {pipeline_mode = #tpu.pipeline_mode<synchronous>, transform_indices = @transform_4, window_bounds = array<i64: 1, 128>}, {pipeline_mode = #tpu.pipeline_mode<synchronous>, transform_indices = @transform_5, window_bounds = array<i64: 128, 128>}, {pipeline_mode = #tpu.pipeline_mode<synchronous>, transform_indices = @transform_6, window_bounds = array<i64: 1, 128>}, {pipeline_mode = #tpu.pipeline_mode<synchronous>, transform_indices = @transform_7, window_bounds = array<i64: 128, 16>}, {pipeline_mode = #tpu.pipeline_mode<synchronous>, transform_indices = @transform_8, window_bounds = array<i64: 1, 16>}, {pipeline_mode = #tpu.pipeline_mode<synchronous>, transform_indices = @transform_9, window_bounds = array<i64: 16, 128>}, {pipeline_mode = #tpu.pipeline_mode<synchronous>, transform_indices = @transform_10, window_bounds = array<i64: 1, 128>}, {pipeline_mode = #tpu.pipeline_mode<synchronous>, transform_indices = @transform_11, window_bounds = array<i64: 128, 128>}, {pipeline_mode = #tpu.pipeline_mode<synchronous>, transform_indices = @transform_12, window_bounds = array<i64: 1, 128>}, {pipeline_mode = #tpu.pipeline_mode<synchronous>, transform_indices = @transform_13, window_bounds = array<i64: 128, 128>}, {pipeline_mode = #tpu.pipeline_mode<synchronous>, transform_indices = @transform_14, window_bounds = array<i64: 1, 128>}, {pipeline_mode = #tpu.pipeline_mode<synchronous>, transform_indices = @transform_15, window_bounds = array<i64: 128, 32>}, {pipeline_mode = #tpu.pipeline_mode<synchronous>, transform_indices = @transform_16, window_bounds = array<i64: 1, 32>}, {transform_indices = @transform_17, window_bounds = array<i64: 16, 32>}, {transform_indices = @transform_18, window_bounds = array<i64: 16, 16>}]} {
    %c0 = arith.constant 0 : index
    %c0_0 = arith.constant 0 : index
    %0 = vector.load %arg1[%c0, %c0_0] : memref<16x32xbf16, #tpu.memory_space<vmem>>, vector<16x32xbf16>
    %c0_1 = arith.constant 0 : index
    %c0_2 = arith.constant 0 : index
    %1 = vector.load %arg2[%c0_1, %c0_2] : memref<32x128xbf16, #tpu.memory_space<vmem>>, vector<32x128xbf16>
    %cst = arith.constant dense<0.000000e+00> : vector<16x128xf32>
    %2 = tpu.matmul %0, %1, %cst {dimension_numbers = #tpu.dot_dimension_numbers<[1], [0], [0], [1], [0, 0, 1, 1], [], []>} : vector<16x32xbf16>, vector<32x128xbf16>, vector<16x128xf32> -> vector<16x128xf32>
    %c0_3 = arith.constant 0 : index
    %c0_4 = arith.constant 0 : index
    %3 = vector.load %arg3[%c0_3, %c0_4] : memref<1x128xf32, #tpu.memory_space<vmem>>, vector<1x128xf32>
    %4 = vector.broadcast %3 : vector<1x128xf32> to vector<16x128xf32>
    %5 = arith.addf %2, %4 : vector<16x128xf32>
    %cst_5 = arith.constant 0.000000e+00 : f32
    %6 = vector.broadcast %cst_5 : f32 to vector<16x128xf32>
    %7 = arith.maximumf %5, %6 : vector<16x128xf32>
    %8 = arith.truncf %7 : vector<16x128xf32> to vector<16x128xbf16>
    %c0_6 = arith.constant 0 : index
    %c0_7 = arith.constant 0 : index
    %9 = vector.load %arg4[%c0_6, %c0_7] : memref<128x128xbf16, #tpu.memory_space<vmem>>, vector<128x128xbf16>
    %cst_8 = arith.constant dense<0.000000e+00> : vector<16x128xf32>
    %10 = tpu.matmul %8, %9, %cst_8 {dimension_numbers = #tpu.dot_dimension_numbers<[1], [0], [0], [1], [0, 0, 1, 1], [], []>} : vector<16x128xbf16>, vector<128x128xbf16>, vector<16x128xf32> -> vector<16x128xf32>
    %c0_9 = arith.constant 0 : index
    %c0_10 = arith.constant 0 : index
    %11 = vector.load %arg5[%c0_9, %c0_10] : memref<1x128xf32, #tpu.memory_space<vmem>>, vector<1x128xf32>
    %12 = vector.broadcast %11 : vector<1x128xf32> to vector<16x128xf32>
    %13 = arith.addf %10, %12 : vector<16x128xf32>
    %cst_11 = arith.constant 0.000000e+00 : f32
    %14 = vector.broadcast %cst_11 : f32 to vector<16x128xf32>
    %15 = arith.maximumf %13, %14 : vector<16x128xf32>
    %16 = arith.truncf %15 : vector<16x128xf32> to vector<16x128xbf16>
    %c0_12 = arith.constant 0 : index
    %c0_13 = arith.constant 0 : index
    %17 = vector.load %arg6[%c0_12, %c0_13] : memref<128x128xbf16, #tpu.memory_space<vmem>>, vector<128x128xbf16>
    %cst_14 = arith.constant dense<0.000000e+00> : vector<16x128xf32>
    %18 = tpu.matmul %16, %17, %cst_14 {dimension_numbers = #tpu.dot_dimension_numbers<[1], [0], [0], [1], [0, 0, 1, 1], [], []>} : vector<16x128xbf16>, vector<128x128xbf16>, vector<16x128xf32> -> vector<16x128xf32>
    %c0_15 = arith.constant 0 : index
    %c0_16 = arith.constant 0 : index
    %19 = vector.load %arg7[%c0_15, %c0_16] : memref<1x128xf32, #tpu.memory_space<vmem>>, vector<1x128xf32>
    %20 = vector.broadcast %19 : vector<1x128xf32> to vector<16x128xf32>
    %21 = arith.addf %18, %20 : vector<16x128xf32>
    %cst_17 = arith.constant 0.000000e+00 : f32
    %22 = vector.broadcast %cst_17 : f32 to vector<16x128xf32>
    %23 = arith.maximumf %21, %22 : vector<16x128xf32>
    %24 = arith.truncf %23 : vector<16x128xf32> to vector<16x128xbf16>
    %c0_18 = arith.constant 0 : index
    %c0_19 = arith.constant 0 : index
    %25 = vector.load %arg8[%c0_18, %c0_19] : memref<128x16xbf16, #tpu.memory_space<vmem>>, vector<128x16xbf16>
    %cst_20 = arith.constant dense<0.000000e+00> : vector<16x16xf32>
    %26 = tpu.matmul %24, %25, %cst_20 {dimension_numbers = #tpu.dot_dimension_numbers<[1], [0], [0], [1], [0, 0, 1, 1], [], []>} : vector<16x128xbf16>, vector<128x16xbf16>, vector<16x16xf32> -> vector<16x16xf32>
    %c0_21 = arith.constant 0 : index
    %c0_22 = arith.constant 0 : index
    %27 = vector.load %arg9[%c0_21, %c0_22] : memref<1x16xf32, #tpu.memory_space<vmem>>, vector<1x16xf32>
    %28 = vector.broadcast %27 : vector<1x16xf32> to vector<16x16xf32>
    %29 = arith.addf %26, %28 : vector<16x16xf32>
    %c0_23 = arith.constant 0 : index
    %c0_24 = arith.constant 0 : index
    %30 = vector.load %arg19[%c0_23, %c0_24] : memref<16x16xf32, #tpu.memory_space<vmem>>, vector<16x16xf32>
    tpu.vector_store %arg19[%c0_23, %c0_24], %29 {strides = array<i32>} : memref<16x16xf32, #tpu.memory_space<vmem>>, vector<16x16xf32>,
    %31 = arith.truncf %29 : vector<16x16xf32> to vector<16x16xbf16>
    %c0_25 = arith.constant 0 : index
    %c0_26 = arith.constant 0 : index
    %32 = vector.load %arg10[%c0_25, %c0_26] : memref<16x128xbf16, #tpu.memory_space<vmem>>, vector<16x128xbf16>
    %cst_27 = arith.constant dense<0.000000e+00> : vector<16x128xf32>
    %33 = tpu.matmul %31, %32, %cst_27 {dimension_numbers = #tpu.dot_dimension_numbers<[1], [0], [0], [1], [0, 0, 1, 1], [], []>} : vector<16x16xbf16>, vector<16x128xbf16>, vector<16x128xf32> -> vector<16x128xf32>
    %c0_28 = arith.constant 0 : index
    %c0_29 = arith.constant 0 : index
    %34 = vector.load %arg11[%c0_28, %c0_29] : memref<1x128xf32, #tpu.memory_space<vmem>>, vector<1x128xf32>
    %35 = vector.broadcast %34 : vector<1x128xf32> to vector<16x128xf32>
    %36 = arith.addf %33, %35 : vector<16x128xf32>
    %cst_30 = arith.constant 0.000000e+00 : f32
    %37 = vector.broadcast %cst_30 : f32 to vector<16x128xf32>
    %38 = arith.maximumf %36, %37 : vector<16x128xf32>
    %39 = arith.truncf %38 : vector<16x128xf32> to vector<16x128xbf16>
    %c0_31 = arith.constant 0 : index
    %c0_32 = arith.constant 0 : index
    %40 = vector.load %arg12[%c0_31, %c0_32] : memref<128x128xbf16, #tpu.memory_space<vmem>>, vector<128x128xbf16>
    %cst_33 = arith.constant dense<0.000000e+00> : vector<16x128xf32>
    %41 = tpu.matmul %39, %40, %cst_33 {dimension_numbers = #tpu.dot_dimension_numbers<[1], [0], [0], [1], [0, 0, 1, 1], [], []>} : vector<16x128xbf16>, vector<128x128xbf16>, vector<16x128xf32> -> vector<16x128xf32>
    %c0_34 = arith.constant 0 : index
    %c0_35 = arith.constant 0 : index
    %42 = vector.load %arg13[%c0_34, %c0_35] : memref<1x128xf32, #tpu.memory_space<vmem>>, vector<1x128xf32>
    %43 = vector.broadcast %42 : vector<1x128xf32> to vector<16x128xf32>
    %44 = arith.addf %41, %43 : vector<16x128xf32>
    %cst_36 = arith.constant 0.000000e+00 : f32
    %45 = vector.broadcast %cst_36 : f32 to vector<16x128xf32>
    %46 = arith.maximumf %44, %45 : vector<16x128xf32>
    %47 = arith.truncf %46 : vector<16x128xf32> to vector<16x128xbf16>
    %c0_37 = arith.constant 0 : index
    %c0_38 = arith.constant 0 : index
    %48 = vector.load %arg14[%c0_37, %c0_38] : memref<128x128xbf16, #tpu.memory_space<vmem>>, vector<128x128xbf16>
    %cst_39 = arith.constant dense<0.000000e+00> : vector<16x128xf32>
    %49 = tpu.matmul %47, %48, %cst_39 {dimension_numbers = #tpu.dot_dimension_numbers<[1], [0], [0], [1], [0, 0, 1, 1], [], []>} : vector<16x128xbf16>, vector<128x128xbf16>, vector<16x128xf32> -> vector<16x128xf32>
    %c0_40 = arith.constant 0 : index
    %c0_41 = arith.constant 0 : index
    %50 = vector.load %arg15[%c0_40, %c0_41] : memref<1x128xf32, #tpu.memory_space<vmem>>, vector<1x128xf32>
    %51 = vector.broadcast %50 : vector<1x128xf32> to vector<16x128xf32>
    %52 = arith.addf %49, %51 : vector<16x128xf32>
    %cst_42 = arith.constant 0.000000e+00 : f32
    %53 = vector.broadcast %cst_42 : f32 to vector<16x128xf32>
    %54 = arith.maximumf %52, %53 : vector<16x128xf32>
    %55 = arith.truncf %54 : vector<16x128xf32> to vector<16x128xbf16>
    %c0_43 = arith.constant 0 : index
    %c0_44 = arith.constant 0 : index
    %56 = vector.load %arg16[%c0_43, %c0_44] : memref<128x32xbf16, #tpu.memory_space<vmem>>, vector<128x32xbf16>
    %cst_45 = arith.constant dense<0.000000e+00> : vector<16x32xf32>
    %57 = tpu.matmul %55, %56, %cst_45 {dimension_numbers = #tpu.dot_dimension_numbers<[1], [0], [0], [1], [0, 0, 1, 1], [], []>} : vector<16x128xbf16>, vector<128x32xbf16>, vector<16x32xf32> -> vector<16x32xf32>
    %c0_46 = arith.constant 0 : index
    %c0_47 = arith.constant 0 : index
    %58 = vector.load %arg17[%c0_46, %c0_47] : memref<1x32xf32, #tpu.memory_space<vmem>>, vector<1x32xf32>
    %59 = vector.broadcast %58 : vector<1x32xf32> to vector<16x32xf32>
    %60 = arith.addf %57, %59 : vector<16x32xf32>
    %c0_48 = arith.constant 0 : index
    %c0_49 = arith.constant 0 : index
    %61 = vector.load %arg18[%c0_48, %c0_49] : memref<16x32xf32, #tpu.memory_space<vmem>>, vector<16x32xf32>
    tpu.vector_store %arg18[%c0_48, %c0_49], %60 {strides = array<i32>} : memref<16x32xf32, #tpu.memory_space<vmem>>, vector<16x32xf32>,
    return
  }
  func.func @transform_0(%arg0: i32) -> (i32, i32) {
    %c0_i32 = arith.constant 0 : i32
    %c0_i32_0 = arith.constant 0 : i32
    return %arg0, %c0_i32 : i32, i32
  }
  func.func @transform_1(%arg0: i32) -> (i32, i32) {
    %c0_i32 = arith.constant 0 : i32
    %c0_i32_0 = arith.constant 0 : i32
    %c0_i32_1 = arith.constant 0 : i32
    return %c0_i32, %c0_i32_0 : i32, i32
  }
  func.func @transform_2(%arg0: i32) -> (i32, i32) {
    %c0_i32 = arith.constant 0 : i32
    %c0_i32_0 = arith.constant 0 : i32
    %c0_i32_1 = arith.constant 0 : i32
    return %c0_i32, %c0_i32_0 : i32, i32
  }
  func.func @transform_3(%arg0: i32) -> (i32, i32) {
    %c0_i32 = arith.constant 0 : i32
    %c0_i32_0 = arith.constant 0 : i32
    %c0_i32_1 = arith.constant 0 : i32
    return %c0_i32, %c0_i32_0 : i32, i32
  }
  func.func @transform_4(%arg0: i32) -> (i32, i32) {
    %c0_i32 = arith.constant 0 : i32
    %c0_i32_0 = arith.constant 0 : i32
    %c0_i32_1 = arith.constant 0 : i32
    return %c0_i32, %c0_i32_0 : i32, i32
  }
  func.func @transform_5(%arg0: i32) -> (i32, i32) {
    %c0_i32 = arith.constant 0 : i32
    %c0_i32_0 = arith.constant 0 : i32
    %c0_i32_1 = arith.constant 0 : i32
    return %c0_i32, %c0_i32_0 : i32, i32
  }
  func.func @transform_6(%arg0: i32) -> (i32, i32) {
    %c0_i32 = arith.constant 0 : i32
    %c0_i32_0 = arith.constant 0 : i32
    %c0_i32_1 = arith.constant 0 : i32
    return %c0_i32, %c0_i32_0 : i32, i32
  }
  func.func @transform_7(%arg0: i32) -> (i32, i32) {
    %c0_i32 = arith.constant 0 : i32
    %c0_i32_0 = arith.constant 0 : i32
    %c0_i32_1 = arith.constant 0 : i32
    return %c0_i32, %c0_i32_0 : i32, i32
  }
  func.func @transform_8(%arg0: i32) -> (i32, i32) {
    %c0_i32 = arith.constant 0 : i32
    %c0_i32_0 = arith.constant 0 : i32
    %c0_i32_1 = arith.constant 0 : i32
    return %c0_i32, %c0_i32_0 : i32, i32
  }
  func.func @transform_9(%arg0: i32) -> (i32, i32) {
    %c0_i32 = arith.constant 0 : i32
    %c0_i32_0 = arith.constant 0 : i32
    %c0_i32_1 = arith.constant 0 : i32
    return %c0_i32, %c0_i32_0 : i32, i32
  }
  func.func @transform_10(%arg0: i32) -> (i32, i32) {
    %c0_i32 = arith.constant 0 : i32
    %c0_i32_0 = arith.constant 0 : i32
    %c0_i32_1 = arith.constant 0 : i32
    return %c0_i32, %c0_i32_0 : i32, i32
  }
  func.func @transform_11(%arg0: i32) -> (i32, i32) {
    %c0_i32 = arith.constant 0 : i32
    %c0_i32_0 = arith.constant 0 : i32
    %c0_i32_1 = arith.constant 0 : i32
    return %c0_i32, %c0_i32_0 : i32, i32
  }
  func.func @transform_12(%arg0: i32) -> (i32, i32) {
    %c0_i32 = arith.constant 0 : i32
    %c0_i32_0 = arith.constant 0 : i32
    %c0_i32_1 = arith.constant 0 : i32
    return %c0_i32, %c0_i32_0 : i32, i32
  }
  func.func @transform_13(%arg0: i32) -> (i32, i32) {
    %c0_i32 = arith.constant 0 : i32
    %c0_i32_0 = arith.constant 0 : i32
    %c0_i32_1 = arith.constant 0 : i32
    return %c0_i32, %c0_i32_0 : i32, i32
  }
  func.func @transform_14(%arg0: i32) -> (i32, i32) {
    %c0_i32 = arith.constant 0 : i32
    %c0_i32_0 = arith.constant 0 : i32
    %c0_i32_1 = arith.constant 0 : i32
    return %c0_i32, %c0_i32_0 : i32, i32
  }
  func.func @transform_15(%arg0: i32) -> (i32, i32) {
    %c0_i32 = arith.constant 0 : i32
    %c0_i32_0 = arith.constant 0 : i32
    %c0_i32_1 = arith.constant 0 : i32
    return %c0_i32, %c0_i32_0 : i32, i32
  }
  func.func @transform_16(%arg0: i32) -> (i32, i32) {
    %c0_i32 = arith.constant 0 : i32
    %c0_i32_0 = arith.constant 0 : i32
    %c0_i32_1 = arith.constant 0 : i32
    return %c0_i32, %c0_i32_0 : i32, i32
  }
  func.func @transform_17(%arg0: i32) -> (i32, i32) {
    %c0_i32 = arith.constant 0 : i32
    %c0_i32_0 = arith.constant 0 : i32
    return %arg0, %c0_i32 : i32, i32
  }
  func.func @transform_18(%arg0: i32) -> (i32, i32) {
    %c0_i32 = arith.constant 0 : i32
    %c0_i32_0 = arith.constant 0 : i32
    return %arg0, %c0_i32 : i32, i32
  }
}

</mosaic_0001>

<bundles_post_ra>
// kernel: tpu_custom_call.1
= control target key start
LH: loop header
LB: loop body
LE: loop exit
PB: predicated region body
PF: predicated region fallthrough
CT: control target
= control target key end

     0   :  { %s2188_s0 = inlined_call_operand.hbm [shape: bf16[16,32], index: 0, kind: input, shape index: {}]   ;;  %s2189_s1 = inlined_call_operand.hbm [shape: bf16[32,128], index: 1, kind: input, shape index: {}]   ;;  %s2190_s2 = inlined_call_operand.hbm [shape: f32[1,128], index: 2, kind: input, shape index: {}]   ;;  %s2191_s3 = inlined_call_operand.vmem [shape: bf16[128,128], index: 3, kind: input, shape index: {}]   ;;  %s2192_s4 = inlined_call_operand.hbm [shape: f32[1,128], index: 4, kind: input, shape index: {}]   ;;  %s2193_s5 = inlined_call_operand.vmem [shape: bf16[128,128], index: 5, kind: input, shape index: {}]   ;;  %s2194_s6 = inlined_call_operand.hbm [shape: f32[1,128], index: 6, kind: input, shape index: {}]   ;;  %s2195_s7 = inlined_call_operand.vmem [shape: bf16[128,16], index: 7, kind: input, shape index: {}]   ;;  %s2196_s8 = inlined_call_operand.hbm [shape: f32[1,16], index: 8, kind: input, shape index: {}]   ;;  %s2197_s9 = inlined_call_operand.hbm [shape: bf16[16,128], index: 9, kind: input, shape index: {}]   ;;  %s2198_s10 = inlined_call_operand.hbm [shape: f32[1,128], index: 10, kind: input, shape index: {}]   ;;  %s2199_s11 = inlined_call_operand.vmem [shape: bf16[128,128], index: 11, kind: input, shape index: {}]   ;;  %s2200_s12 = inlined_call_operand.hbm [shape: f32[1,128], index: 12, kind: input, shape index: {}]   ;;  %s2201_s13 = inlined_call_operand.hbm [shape: bf16[128,128], index: 13, kind: input, shape index: {}]   ;;  %s2202_s14 = inlined_call_operand.hbm [shape: f32[1,128], index: 14, kind: input, shape index: {}]   ;;  %s2203_s15 = inlined_call_operand.vmem [shape: bf16[128,32], index: 15, kind: input, shape index: {}]   ;;  %s2204_s16 = inlined_call_operand.vmem [shape: f32[1,32], index: 16, kind: input, shape index: {}]   ;;  %s2205_s17 = inlined_call_operand.hbm [shape: f32[16,32], index: 17, kind: output, shape index: {0}]   ;;  %s2206_s18 = inlined_call_operand.hbm [shape: f32[16,16], index: 18, kind: output, shape index: {1}]  }
   0x1   :  { %2212 = sst [smem:[#allocation31_spill]] %s2188_s0 }
   0x2   :  { %2213 = sst [smem:[#allocation32_spill]] %s2189_s1 }
   0x3   :  { %2214 = sst [smem:[#allocation33_spill]] %s2190_s2 }
   0x4   :  { %24 = vsyncpa [#allocation3], 0 }
   0x5   :  { %25 = vsyncpa [#allocation6], 0 }
   0x6   :  { %26 = vsyncpa [#allocation9], 0 }
   0x7   :  { %27 = vsyncpa [#allocation12], 0 }
   0x8   :  { %28 = vsyncpa [#allocation15], 0 }
   0x9   :  { %29 = vsyncpa [#allocation18], 0 }
   0xa   :  { %30 = vsyncpa [#allocation4], 0 }
   0xb   :  { %31 = vsyncpa [#allocation22], 0  ;;  %s1692_s27 = smov [#allocation5]   ;;  %s1693_s29 = smov [#allocation8]  }
   0xc   :  { %s49_s28 = sshll.u32 %s1692_s27, 4  ;;  %s74_s30 = sshll.u32 %s1693_s29, 4  ;;  %s50_s28 = int_to_ptr.vmem [resolvable:$true] %s49_s28  ;;  %s1806_s30 = int_to_ptr.vmem [resolvable:$true] %s74_s30 }
   0xd   :  { %s2215_s1 = sld [smem:[#allocation32_spill]] }
  0x13   :  { %s1390_s20 = scalar_lea.hbm %s2215_s1, 256 }
  0x14   :  { %p1391_p0 = scmp.ne.s32.totalorder %s2215_s1, %s1390_s20  ;;  %p1394_p1 = scmp.lt.u32.totalorder %s1390_s20, %s2215_s1 }
  0x16   :  { %p1396_p2 = pnand %p1394_p1, %p1391_p0 }
  0x18   :  { %1399 = shalt.err (!%p1396_p2)
}
  0x19   :  { %s1400_s24 = scalar_lea.vmem %s50_s28, 256  ;;  %p1405_p4 = scmp.lt.s32.totalorder %s50_s28, %s50_s28 }
  0x1a   :  { %p1401_p3 = scmp.ne.s32.totalorder %s50_s28, %s1400_s24  ;;  %p1406_p5 = scmp.lt.s32.totalorder %s1400_s24, %s1400_s24 }
  0x1c   :  { %p1407_p6 = por %p1406_p5, %p1405_p4 }
  0x1e   :  { %p1408_p7 = pnand %p1407_p6, %p1401_p3 }
  0x20   :  { %1411 = shalt.err (!%p1408_p7)
}
  0x21   :  { %s2210_s25 = smov 64   ;;  %s1695_s26 = smov 4  }
  0x22   :  { %55 = dma.hbm_to_vmem [thread:$0]  %s2215_s1, 256, %s50_s28, [#allocation6], %s2210_s25, %s2210_s25, %s1695_s26  }
  0x23   :  { %s1412_s20 = scalar_lea.hbm %s2192_s4, 16 }
  0x24   :  { %p1413_p8 = scmp.ne.s32.totalorder %s2192_s4, %s1412_s20  ;;  %p1416_p9 = scmp.lt.u32.totalorder %s1412_s20, %s2192_s4 }
  0x26   :  { %p1418_p10 = pnand %p1416_p9, %p1413_p8 }
  0x28   :  { %1421 = shalt.err (!%p1418_p10)
}
  0x29   :  { %s1422_s24 = scalar_lea.vmem %s1806_s30, 16  ;;  %s1426_s28 = scalar_lea.vmem %s1806_s30, 32 }
  0x2a   :  { %p1423_p11 = scmp.ne.s32.totalorder %s1806_s30, %s1422_s24  ;;  %p1427_p12 = scmp.lt.s32.totalorder %s1806_s30, %s1806_s30 }
  0x2b   :  { %p1428_p13 = scmp.lt.s32.totalorder %s1426_s28, %s1422_s24 }
  0x2d   :  { %p1429_p0 = por %p1428_p13, %p1427_p12 }
  0x2f   :  { %p1430_p1 = pnand %p1429_p0, %p1423_p11 }
  0x31   :  { %1433 = shalt.err (!%p1430_p1)
}
  0x32   :  { %77 = dma.hbm_to_vmem [thread:$0]  %s2192_s4, 16, %s1806_s30, [#allocation9]  }
  0x33   :  { %s1696_s29 = smov [#allocation11]   ;;  %s1697_s19 = smov [#allocation14]  }
  0x34   :  { %s98_s0 = sshll.u32 %s1696_s29, 4  ;;  %s120_s20 = sshll.u32 %s1697_s19, 4  ;;  %s99_s0 = int_to_ptr.vmem [resolvable:$true] %s98_s0  ;;  %s121_s20 = int_to_ptr.vmem [resolvable:$true] %s120_s20 }
  0x35   :  { %s1434_s2 = scalar_lea.hbm %s2196_s8, 16 }
  0x36   :  { %p1435_p2 = scmp.ne.s32.totalorder %s2196_s8, %s1434_s2  ;;  %p1438_p3 = scmp.lt.u32.totalorder %s1434_s2, %s2196_s8 }
  0x38   :  { %p1440_p4 = pnand %p1438_p3, %p1435_p2 }
  0x3a   :  { %1443 = shalt.err (!%p1440_p4)
}
  0x3b   :  { %s1444_s4 = scalar_lea.vmem %s99_s0, 16  ;;  %s1448_s30 = scalar_lea.vmem %s99_s0, 32 }
  0x3c   :  { %p1445_p5 = scmp.ne.s32.totalorder %s99_s0, %s1444_s4  ;;  %p1449_p6 = scmp.lt.s32.totalorder %s99_s0, %s99_s0 }
  0x3d   :  { %p1450_p7 = scmp.lt.s32.totalorder %s1448_s30, %s1444_s4 }
  0x3f   :  { %p1451_p8 = por %p1450_p7, %p1449_p6 }
  0x41   :  { %p1452_p9 = pnand %p1451_p8, %p1445_p5 }
  0x43   :  { %1455 = shalt.err (!%p1452_p9)
}
  0x44   :  { %101 = dma.hbm_to_vmem [thread:$0]  %s2196_s8, 16, %s99_s0, [#allocation12]  }
  0x45   :  { %s1456_s21 = scalar_lea.hbm %s2198_s10, 16 }
  0x46   :  { %p1457_p10 = scmp.ne.s32.totalorder %s2198_s10, %s1456_s21  ;;  %p1460_p11 = scmp.lt.u32.totalorder %s1456_s21, %s2198_s10 }
  0x48   :  { %p1462_p12 = pnand %p1460_p11, %p1457_p10 }
  0x4a   :  { %1465 = shalt.err (!%p1462_p12)
}
  0x4b   :  { %s1466_s24 = scalar_lea.vmem %s121_s20, 16  ;;  %s1470_s28 = scalar_lea.vmem %s121_s20, 32 }
  0x4c   :  { %p1467_p13 = scmp.ne.s32.totalorder %s121_s20, %s1466_s24  ;;  %p1471_p0 = scmp.lt.s32.totalorder %s121_s20, %s121_s20 }
  0x4d   :  { %p1472_p1 = scmp.lt.s32.totalorder %s1470_s28, %s1466_s24 }
  0x4f   :  { %p1473_p2 = por %p1472_p1, %p1471_p0 }
  0x51   :  { %p1474_p3 = pnand %p1473_p2, %p1467_p13 }
  0x53   :  { %1477 = shalt.err (!%p1474_p3)
}
  0x54   :  { %123 = dma.hbm_to_vmem [thread:$0]  %s2198_s10, 16, %s121_s20, [#allocation15]  }
  0x55   :  { %s1698_s4 = smov [#allocation17]   ;;  %s1699_s1 = smov [#allocation2]  }
  0x56   :  { %s141_s30 = sshll.u32 %s1698_s4, 4  ;;  %s37_s27 = sshll.u32 %s1699_s1, 4  ;;  %s142_s30 = int_to_ptr.vmem [resolvable:$true] %s141_s30  ;;  %s1865_s27 = int_to_ptr.vmem [resolvable:$true] %s37_s27 }
  0x57   :  { %s1478_s21 = scalar_lea.hbm %s2201_s13, 1024 }
  0x58   :  { %p1479_p4 = scmp.ne.s32.totalorder %s2201_s13, %s1478_s21  ;;  %p1482_p5 = scmp.lt.u32.totalorder %s1478_s21, %s2201_s13 }
  0x5a   :  { %p1484_p6 = pnand %p1482_p5, %p1479_p4 }
  0x5c   :  { %1487 = shalt.err (!%p1484_p6)
}
  0x5d   :  { %s1488_s10 = scalar_lea.vmem %s142_s30, 1024  ;;  %p1493_p8 = scmp.lt.s32.totalorder %s142_s30, %s142_s30 }
  0x5e   :  { %p1489_p7 = scmp.ne.s32.totalorder %s142_s30, %s1488_s10  ;;  %p1494_p9 = scmp.lt.s32.totalorder %s1488_s10, %s1488_s10 }
  0x60   :  { %p1495_p10 = por %p1494_p9, %p1493_p8 }
  0x62   :  { %p1496_p11 = pnand %p1495_p10, %p1489_p7 }
  0x64   :  { %1499 = shalt.err (!%p1496_p11)
}
  0x65   :  { %s2216_s20 = smov 64   ;;  %s2217_s4 = sld [smem:[#allocation31_spill]] }
  0x66   :  { %147 = dma.hbm_to_vmem [thread:$0]  %s2201_s13, 1024, %s142_s30, [#allocation18], %s2216_s20, %s2216_s20, %s1695_s26  }
  0x6b   :  { %s1500_s1 = scalar_lea.hbm %s2217_s4, 128 }
  0x6c   :  { %p1501_p12 = scmp.ne.s32.totalorder %s2217_s4, %s1500_s1  ;;  %p1504_p13 = scmp.lt.u32.totalorder %s1500_s1, %s2217_s4 }
  0x6e   :  { %p1506_p0 = pnand %p1504_p13, %p1501_p12 }
  0x70   :  { %1509 = shalt.err (!%p1506_p0)
}
  0x71   :  { %s1510_s22 = scalar_lea.vmem %s1865_s27, 128  ;;  %p1515_p2 = scmp.lt.s32.totalorder %s1865_s27, %s1865_s27 }
  0x72   :  { %p1511_p1 = scmp.ne.s32.totalorder %s1865_s27, %s1510_s22  ;;  %p1516_p3 = scmp.lt.s32.totalorder %s1510_s22, %s1510_s22 }
  0x74   :  { %p1517_p4 = por %p1516_p3, %p1515_p2 }
  0x76   :  { %p1518_p5 = pnand %p1517_p4, %p1511_p1 }
  0x78   :  { %1521 = shalt.err (!%p1518_p5)
}
  0x79   :  { %43 = dma.hbm_to_vmem [thread:$0]  %s2217_s4, 128, %s1865_s27, [#allocation3], %s2216_s20, %s2216_s20, %s1695_s26  }
  0x7a   :  { %s1700_s2 = smov [#allocation7]   ;;  %s1701_s10 = smov [#allocation10]  }
  0x7b   :  { %s62_s23 = sshll.u32 %s1700_s2, 4  ;;  %s86_s24 = sshll.u32 %s1701_s10, 4  ;;  %s63_s23 = int_to_ptr.vmem [resolvable:$true] %s62_s23  ;;  %s87_s24 = int_to_ptr.vmem [resolvable:$true] %s86_s24 }
  0x7c   :  { %s2218_s0 = sld [smem:[#allocation33_spill]] }
  0x82   :  { %s1522_s1 = scalar_lea.hbm %s2218_s0, 16 }
  0x83   :  { %p1523_p6 = scmp.ne.s32.totalorder %s2218_s0, %s1522_s1  ;;  %p1526_p7 = scmp.lt.u32.totalorder %s1522_s1, %s2218_s0 }
  0x85   :  { %p1528_p8 = pnand %p1526_p7, %p1523_p6 }
  0x87   :  { %1531 = shalt.err (!%p1528_p8)
}
  0x88   :  { %s1532_s27 = scalar_lea.vmem %s63_s23, 16  ;;  %s1536_s4 = scalar_lea.vmem %s63_s23, 32 }
  0x89   :  { %p1533_p9 = scmp.ne.s32.totalorder %s63_s23, %s1532_s27  ;;  %p1537_p10 = scmp.lt.s32.totalorder %s63_s23, %s63_s23 }
  0x8a   :  { %p1538_p11 = scmp.lt.s32.totalorder %s1536_s4, %s1532_s27 }
  0x8c   :  { %p1539_p12 = por %p1538_p11, %p1537_p10 }
  0x8e   :  { %p1540_p13 = pnand %p1539_p12, %p1533_p9 }
  0x90   :  { %1543 = shalt.err (!%p1540_p13)
}
  0x91   :  { %65 = dma.hbm_to_vmem [thread:$0]  %s2218_s0, 16, %s63_s23, [#allocation6]  }
  0x92   :  { %s1544_s10 = scalar_lea.hbm %s2194_s6, 16 }
  0x93   :  { %p1545_p0 = scmp.ne.s32.totalorder %s2194_s6, %s1544_s10  ;;  %p1548_p1 = scmp.lt.u32.totalorder %s1544_s10, %s2194_s6 }
  0x95   :  { %p1550_p2 = pnand %p1548_p1, %p1545_p0 }
  0x97   :  { %1553 = shalt.err (!%p1550_p2)
}
  0x98   :  { %s1554_s19 = scalar_lea.vmem %s87_s24, 16  ;;  %s1558_s21 = scalar_lea.vmem %s87_s24, 32 }
  0x99   :  { %p1555_p3 = scmp.ne.s32.totalorder %s87_s24, %s1554_s19  ;;  %p1559_p4 = scmp.lt.s32.totalorder %s87_s24, %s87_s24 }
  0x9a   :  { %p1560_p5 = scmp.lt.s32.totalorder %s1558_s21, %s1554_s19 }
  0x9c   :  { %p1561_p6 = por %p1560_p5, %p1559_p4 }
  0x9e   :  { %p1562_p7 = pnand %p1561_p6, %p1555_p3 }
  0xa0   :  { %1565 = shalt.err (!%p1562_p7)
}
  0xa1   :  { %89 = dma.hbm_to_vmem [thread:$0]  %s2194_s6, 16, %s87_s24, [#allocation9]  }
  0xa2   :  { %s1702_s25 = smov [#allocation13]   ;;  %s1703_s4 = smov [#allocation16]  }
  0xa3   :  { %s107_s27 = sshll.u32 %s1702_s25, 4  ;;  %s132_s22 = sshll.u32 %s1703_s4, 4  ;;  %s108_s27 = int_to_ptr.vmem [resolvable:$true] %s107_s27  ;;  %s133_s22 = int_to_ptr.vmem [resolvable:$true] %s132_s22 }
  0xa4   :  { %s1566_s2 = scalar_lea.hbm %s2197_s9, 128 }
  0xa5   :  { %p1567_p8 = scmp.ne.s32.totalorder %s2197_s9, %s1566_s2  ;;  %p1570_p9 = scmp.lt.u32.totalorder %s1566_s2, %s2197_s9 }
  0xa7   :  { %p1572_p10 = pnand %p1570_p9, %p1567_p8 }
  0xa9   :  { %1575 = shalt.err (!%p1572_p10)
}
  0xaa   :  { %s1576_s6 = scalar_lea.vmem %s108_s27, 128  ;;  %p1581_p12 = scmp.lt.s32.totalorder %s108_s27, %s108_s27 }
  0xab   :  { %p1577_p11 = scmp.ne.s32.totalorder %s108_s27, %s1576_s6  ;;  %p1582_p13 = scmp.lt.s32.totalorder %s1576_s6, %s1576_s6 }
  0xad   :  { %p1583_p0 = por %p1582_p13, %p1581_p12 }
  0xaf   :  { %p1584_p1 = pnand %p1583_p0, %p1577_p11 }
  0xb1   :  { %1587 = shalt.err (!%p1584_p1)
}
  0xb2   :  { %113 = dma.hbm_to_vmem [thread:$0]  %s2197_s9, 128, %s108_s27, [#allocation12], %s2216_s20, %s2216_s20, %s1695_s26  }
  0xb3   :  { %s1588_s23 = scalar_lea.hbm %s2200_s12, 16 }
  0xb4   :  { %p1589_p2 = scmp.ne.s32.totalorder %s2200_s12, %s1588_s23  ;;  %p1592_p3 = scmp.lt.u32.totalorder %s1588_s23, %s2200_s12 }
  0xb6   :  { %p1594_p4 = pnand %p1592_p3, %p1589_p2 }
  0xb8   :  { %1597 = shalt.err (!%p1594_p4)
}
  0xb9   :  { %s1598_s30 = scalar_lea.vmem %s133_s22, 16  ;;  %s1602_s2 = scalar_lea.vmem %s133_s22, 32 }
  0xba   :  { %p1599_p5 = scmp.ne.s32.totalorder %s133_s22, %s1598_s30  ;;  %p1603_p6 = scmp.lt.s32.totalorder %s133_s22, %s133_s22 }
  0xbb   :  { %p1604_p7 = scmp.lt.s32.totalorder %s1602_s2, %s1598_s30 }
  0xbd   :  { %p1605_p8 = por %p1604_p7, %p1603_p6 }
  0xbf   :  { %p1606_p9 = pnand %p1605_p8, %p1599_p5 }
  0xc1   :  { %1609 = shalt.err (!%p1606_p9)
}
  0xc2   :  { %135 = dma.hbm_to_vmem [thread:$0]  %s2200_s12, 16, %s133_s22, [#allocation15]  }
  0xc3   :  { %s1704_s20 = smov [#allocation19]   ;;  %s1610_s8 = scalar_lea.hbm %s2202_s14, 16 }
  0xc4   :  { %s154_s27 = sshll.u32 %s1704_s20, 4  ;;  %p1611_p10 = scmp.ne.s32.totalorder %s2202_s14, %s1610_s8  ;;  %s155_s27 = int_to_ptr.vmem [resolvable:$true] %s154_s27 }
  0xc5   :  { %p1614_p11 = scmp.lt.u32.totalorder %s1610_s8, %s2202_s14 }
  0xc7   :  { %p1616_p12 = pnand %p1614_p11, %p1611_p10 }
  0xc9   :  { %1619 = shalt.err (!%p1616_p12)
}
  0xca   :  { %s1620_s19 = scalar_lea.vmem %s155_s27, 16  ;;  %s1624_s12 = scalar_lea.vmem %s155_s27, 32 }
  0xcb   :  { %p1621_p13 = scmp.ne.s32.totalorder %s155_s27, %s1620_s19  ;;  %p1625_p0 = scmp.lt.s32.totalorder %s155_s27, %s155_s27 }
  0xcc   :  { %p1626_p1 = scmp.lt.s32.totalorder %s1624_s12, %s1620_s19 }
  0xce   :  { %p1627_p2 = por %p1626_p1, %p1625_p0 }
  0xd0   :  { %p1628_p3 = pnand %p1627_p2, %p1621_p13 }
  0xd2   :  { %1631 = shalt.err (!%p1628_p3)
}
  0xd3   :  { %157 = dma.hbm_to_vmem [thread:$0]  %s2202_s14, 16, %s155_s27, [#allocation18]  }
  0xd4   :  { %1676 = dma.done.wait [#allocation3], 128  }
  0xd5   :  { %1677 = vsyncadd [#allocation3], 4294967168 }
  0xd6   :  { %1678 = dma.done.wait [#allocation6], 272  }
  0xd7   :  { %1679 = vsyncadd [#allocation6], 4294967024 }
  0xd8   :  { %1680 = dma.done.wait [#allocation9], 32  }
  0xd9   :  { %1681 = vsyncadd [#allocation9], 4294967264 }
  0xda   :  { %1682 = dma.done.wait [#allocation12], 144  }
  0xdb   :  { %1683 = vsyncadd [#allocation12], 4294967152 }
  0xdc   :  { %1684 = dma.done.wait [#allocation15], 32  }
  0xdd   :  { %1685 = vsyncadd [#allocation15], 4294967264 }
  0xde   :  { %1686 = dma.done.wait [#allocation18], 1040  }
  0xdf   :  { %1687 = vsyncadd [#allocation18], 4294966256  ;;  %v1705_v0 = vmov 0.0   ;;  %vm1706_vm0 = vmmov 0   ;;  %v1338_v1 = vld [vmem:[#allocation5] sm:$0xff]   ;;  %v1339_v2 = vld [vmem:[#allocation5 + $0x8] sm:$0xff]  }
  0xe0   :  { %1185 = vmatprep.subr.bf16.mxu1 %v1705_v0  ;;  %1189 = vmatprep.mubr.msk.bf16.mxu1 %vm1706_vm0, %v1705_v0  ;;  %v1340_v3 = vld [vmem:[#allocation2] sm:$0xff]   ;;  %vm226_vm1 = vcmask 261120   ;;  %v1342_v5 = vld [vmem:[%s2191_s3 + $0x8] sm:$0xff]   ;;  %v1343_v6 = vld [vmem:[%s2191_s3 + $0x10] sm:$0xff]   ;;  %vm616_vm2 = vcmask 130048   ;;  %s1707_s25 = smov [#allocation21]  }
  0xe1   :  { %1213 = vmatprep.subr.bf16.mxu0 %v1705_v0  ;;  %1229 = vmatprep.mubr.msk.bf16.mxu0 %vm1706_vm0, %v1705_v0  ;;  %v1341_v4 = vld [vmem:[%s2191_s3] sm:$0xff]   ;;  %v1344_v7 = vld [vmem:[%s2191_s3 + $0x18] sm:$0xff]   ;;  %v1346_v9 = vld [vmem:[%s2191_s3 + $0x28] sm:$0xff]   ;;  %s1043_s4 = sshll.u32 %s1707_s25, 4  ;;  %s1044_s4 = int_to_ptr.vmem [resolvable:$true] %s1043_s4 }
  0xe2   :  { %1186 = vmatpush3.bf16.msra.mxu1 %v1338_v1  ;;  %v1345_v8 = vld [vmem:[%s2191_s3 + $0x20] sm:$0xff]   ;;  %v1347_v10 = vld [vmem:[%s2191_s3 + $0x30] sm:$0xff]   ;;  %v1348_v11 = vld [vmem:[%s2191_s3 + $0x38] sm:$0xff]   ;;  %s1632_s13 = scalar_lea.vmem %s1044_s4, 256  ;;  %p1637_p5 = scmp.lt.s32.totalorder %s1044_s4, %s1044_s4 }
  0xe3   :  { %1187 = vmatprep.subr.bf16.mxu1 %v1705_v0  ;;  %v1349_v12 = vld [vmem:[%s2193_s5] sm:$0xff]   ;;  %v1350_v13 = vld [vmem:[%s2193_s5 + $0x8] sm:$0xff]   ;;  %v1351_v14 = vld [vmem:[%s2193_s5 + $0x10] sm:$0xff]   ;;  %p1633_p4 = scmp.ne.s32.totalorder %s1044_s4, %s1632_s13  ;;  %p1638_p6 = scmp.lt.s32.totalorder %s1632_s13, %s1632_s13 }
  0xe4   :  { %1214 = vmatpush3.bf16.msra.mxu0 %v1349_v12  ;;  %v1352_v15 = vld [vmem:[%s2193_s5 + $0x18] sm:$0xff]   ;;  %v1353_v16 = vld [vmem:[%s2193_s5 + $0x20] sm:$0xff]   ;;  %v1354_v17 = vld [vmem:[%s2193_s5 + $0x28] sm:$0xff]  }
  0xe5   :  { %1215 = vmatprep.subr.bf16.mxu0 %v1705_v0  ;;  %v1064_v18 = vld [vmem:[#allocation7] ss:$0 sm:$0xff]  ;;  %v1355_v28 = vld [vmem:[%s2193_s5 + $0x30] sm:$0xff]   ;;  %v1357_v30 = vld [vmem:[%s2195_s7] sm:$0xff]   ;;  %p1639_p7 = por %p1638_p6, %p1637_p5 }
  0xe6   :  { %1188 = vmatpush3.bf16.msra.mxu1 %v1339_v2  ;;  %v1356_v29 = vld [vmem:[%s2193_s5 + $0x38] sm:$0xff]   ;;  %v1358_v31 = vld [vmem:[%s2195_s7 + $0x8] sm:$0xff]   ;;  %v1359_v32 = vld [vmem:[%s2195_s7 + $0x10] sm:$0xff]  }
  0xe7   :  { %1193 = vmatprep.subr.bf16.mxu1 %v1705_v0  ;;  %v1360_v33 = vld [vmem:[%s2195_s7 + $0x18] sm:$0xff]   ;;  %v1361_v34 = vld [vmem:[%s2195_s7 + $0x20] sm:$0xff]   ;;  %v1362_v35 = vld [vmem:[%s2195_s7 + $0x28] sm:$0xff]   ;;  %p1640_p8 = pnand %p1639_p7, %p1633_p4 }
  0xe8   :  { %1216 = vmatpush3.bf16.msra.mxu0 %v1350_v13  ;;  %v1069_v36 = vld [vmem:[#allocation8] ss:$0 sm:$0xff]  ;;  %v1363_v46 = vld [vmem:[%s2195_s7 + $0x30] sm:$0xff]   ;;  %v1365_v48 = vld [vmem:[#allocation13] sm:$0xff]  }
  0xe9   :  { %1190 = vmatmul.mubr.msk.bf16.vlgmr.msra.gmra.mrb[0].mxu1 %vm226_vm1, %v1340_v3  ;;  %1217 = vmatprep.subr.bf16.mxu0 %v1705_v0  ;;  %v1364_v47 = vld [vmem:[%s2195_s7 + $0x38] sm:$0xff]   ;;  %v1366_v3 = vld [vmem:[%s2199_s11] sm:$0xff]   ;;  %v1374_v12 = vld [vmem:[#allocation17] sm:$0xff]  }
  0xea   :  { %1194 = vmatpush3.bf16.msra.mxu1 %v1341_v4  ;;  %1209 = vmatprep.mubr.msk.bf16.mxu1 %vm1706_vm0, %v1705_v0  ;;  %v1078_v49 = vld [vmem:[#allocation10] ss:$0 sm:$0xff]  ;;  %v1087_v59 = vld [vmem:[#allocation11] ss:$0 sm:$0xff]  ;;  %v1375_v13 = vld [vmem:[#allocation17 + $0x8] sm:$0xff]  }
  0xeb   :  { %1195 = vmatprep.subr.bf16.mxu1 %v1705_v0 }
  0xec   :  { %1218 = vmatpush3.bf16.msra.mxu0 %v1351_v14  ;;  %v1376_v14 = vld [vmem:[#allocation17 + $0x10] sm:$0xff]  }
  0xed   :  { %1219 = vmatprep.subr.bf16.mxu0 %v1705_v0 }
  0xee   :  { %1196 = vmatpush3.bf16.msra.mxu1 %v1342_v5  ;;  %v1367_v5 = vld [vmem:[%s2199_s11 + $0x8] sm:$0xff]  }
  0xef   :  { %1197 = vmatprep.subr.bf16.mxu1 %v1705_v0 }
  0xf0   :  { %1220 = vmatpush3.bf16.msra.mxu0 %v1352_v15  ;;  %v1377_v15 = vld [vmem:[#allocation17 + $0x18] sm:$0xff]  }
  0xf1   :  { %1221 = vmatprep.subr.bf16.mxu0 %v1705_v0 }
  0xf2   :  { %1198 = vmatpush3.bf16.msra.mxu1 %v1343_v6  ;;  %v1368_v6 = vld [vmem:[%s2199_s11 + $0x10] sm:$0xff]  }
  0xf3   :  { %1199 = vmatprep.subr.bf16.mxu1 %v1705_v0 }
  0xf4   :  { %1222 = vmatpush3.bf16.msra.mxu0 %v1353_v16  ;;  %v1378_v16 = vld [vmem:[#allocation17 + $0x20] sm:$0xff]  }
  0xf5   :  { %1223 = vmatprep.subr.bf16.mxu0 %v1705_v0 }
  0xf6   :  { %1200 = vmatpush3.bf16.msra.mxu1 %v1344_v7  ;;  %v1369_v7 = vld [vmem:[%s2199_s11 + $0x18] sm:$0xff]  }
  0xf7   :  { %1201 = vmatprep.subr.bf16.mxu1 %v1705_v0 }
  0xf8   :  { %1224 = vmatpush3.bf16.msra.mxu0 %v1354_v17  ;;  %v1379_v17 = vld [vmem:[#allocation17 + $0x28] sm:$0xff]  }
  0xf9   :  { %1225 = vmatprep.subr.bf16.mxu0 %v1705_v0 }
  0xfa   :  { %1202 = vmatpush3.bf16.msra.mxu1 %v1345_v8  ;;  %v1370_v8 = vld [vmem:[%s2199_s11 + $0x20] sm:$0xff]  }
  0xfb   :  { %1203 = vmatprep.subr.bf16.mxu1 %v1705_v0 }
  0xfc   :  { %1226 = vmatpush3.bf16.msra.mxu0 %v1355_v28  ;;  %v1380_v28 = vld [vmem:[#allocation17 + $0x30] sm:$0xff]  }
  0xfd   :  { %1227 = vmatprep.subr.bf16.mxu0 %v1705_v0 }
  0xfe   :  { %1204 = vmatpush3.bf16.msra.mxu1 %v1346_v9  ;;  %v1371_v9 = vld [vmem:[%s2199_s11 + $0x28] sm:$0xff]  }
  0xff   :  { %1205 = vmatprep.subr.bf16.mxu1 %v1705_v0 }
 0x100   :  { %1228 = vmatpush3.bf16.msra.mxu0 %v1356_v29  ;;  %v1381_v29 = vld [vmem:[#allocation17 + $0x38] sm:$0xff]  }
 0x101   :  { %1253 = vmatprep.subr.bf16.mxu0 %v1705_v0 }
 0x102   :  { %1206 = vmatpush3.bf16.msra.mxu1 %v1347_v10  ;;  %v1372_v10 = vld [vmem:[%s2199_s11 + $0x30] sm:$0xff]  }
 0x103   :  { %1207 = vmatprep.subr.bf16.mxu1 %v1705_v0 }
 0x106   :  { %1208 = vmatpush3.bf16.msra.mxu1 %v1348_v11  ;;  %v1373_v11 = vld [vmem:[%s2199_s11 + $0x38] sm:$0xff]  }
 0x107   :  { %1233 = vmatprep.subr.bf16.mxu1 %v1705_v0 }
 0x1bc   :  { %v264_v19 = vpop.f32.mrb[0].mxu1 }
 0x1bd   :  { %v265_v20 = vadd.f32 %v1064_v18, %v264_v19  ;;  %v1191_v21 = vpop.f32.mrb[1].mxu1 }
 0x1be   :  { %v267_v22 = vpop.f32.mrb[2].mxu1 }
 0x1bf   :  { %v268_v23 = vadd.f32 %v1064_v18, %v267_v22  ;;  %v1192_v24 = vpop.f32.mrb[3].mxu1  ;;  %v271_v25 = vmax.f32 %v265_v20, 0.0  ;;  %v1096_v18 = vld [vmem:[#allocation14] ss:$0 sm:$0xff] }
 0x1c1   :  { %v272_v26 = vmax.f32 %v268_v23, 0.0 }
 0x1c3   :  { %v273_v27 = vpack.c.bf16 %v272_v26, %v271_v25 }
 0x1c5   :  { %1210 = vmatmul.mubr.bf16.vlgmr.msra.gmra.mrb[4].mxu1 %v273_v27 }
 0x1c6   :  { %1249 = vmatprep.mubr.msk.bf16.mxu1 %vm1706_vm0, %v1705_v0  ;;  %1234 = vmatpush3.bf16.msra.mxu1 %v1357_v30  ;;  %v1382_v30 = vld [vmem:[%s2203_s15] sm:$0xff]  }
 0x1c7   :  { %1235 = vmatprep.subr.bf16.mxu1 %v1705_v0 }
 0x1ca   :  { %1236 = vmatpush3.bf16.msra.mxu1 %v1358_v31  ;;  %v1383_v31 = vld [vmem:[%s2203_s15 + $0x8] sm:$0xff]  }
 0x1cb   :  { %1237 = vmatprep.subr.bf16.mxu1 %v1705_v0 }
 0x1ce   :  { %1238 = vmatpush3.bf16.msra.mxu1 %v1359_v32  ;;  %v1384_v32 = vld [vmem:[%s2203_s15 + $0x10] sm:$0xff]  }
 0x1cf   :  { %1239 = vmatprep.subr.bf16.mxu1 %v1705_v0 }
 0x1d2   :  { %1240 = vmatpush3.bf16.msra.mxu1 %v1360_v33  ;;  %v1385_v33 = vld [vmem:[%s2203_s15 + $0x18] sm:$0xff]  }
 0x1d3   :  { %1241 = vmatprep.subr.bf16.mxu1 %v1705_v0 }
 0x1d6   :  { %1242 = vmatpush3.bf16.msra.mxu1 %v1361_v34  ;;  %v1386_v34 = vld [vmem:[%s2203_s15 + $0x20] sm:$0xff]  }
 0x1d7   :  { %1243 = vmatprep.subr.bf16.mxu1 %v1705_v0 }
 0x1da   :  { %1244 = vmatpush3.bf16.msra.mxu1 %v1362_v35  ;;  %v1387_v35 = vld [vmem:[%s2203_s15 + $0x28] sm:$0xff]  }
 0x1db   :  { %1245 = vmatprep.subr.bf16.mxu1 %v1705_v0 }
 0x1de   :  { %1246 = vmatpush3.bf16.msra.mxu1 %v1363_v46  ;;  %v1388_v46 = vld [vmem:[%s2203_s15 + $0x30] sm:$0xff]  }
 0x1df   :  { %1247 = vmatprep.subr.bf16.mxu1 %v1705_v0 }
 0x1e2   :  { %1248 = vmatpush3.bf16.msra.mxu1 %v1364_v47  ;;  %v1389_v47 = vld [vmem:[%s2203_s15 + $0x38] sm:$0xff]  }
 0x1e3   :  { %1279 = vmatprep.subr.bf16.mxu1 %v1705_v0 }
 0x298   :  { %v379_v37 = vpop.f32.mrb[4].mxu1 }
 0x299   :  { %v380_v38 = vadd.f32 %v1069_v36, %v379_v37  ;;  %v1211_v39 = vpop.f32.mrb[5].mxu1 }
 0x29a   :  { %v382_v40 = vpop.f32.mrb[6].mxu1 }
 0x29b   :  { %v383_v41 = vadd.f32 %v1069_v36, %v382_v40  ;;  %v1212_v42 = vpop.f32.mrb[7].mxu1  ;;  %v386_v43 = vmax.f32 %v380_v38, 0.0  ;;  %v1099_v36 = vld [vmem:[#allocation16] ss:$0 sm:$0xff] }
 0x29d   :  { %v387_v44 = vmax.f32 %v383_v41, 0.0 }
 0x29f   :  { %v388_v45 = vpack.c.bf16 %v387_v44, %v386_v43 }
 0x2a1   :  { %1230 = vmatmul.mubr.bf16.vlgmr.msra.gmra.mrb[0].mxu0 %v388_v45 }
 0x2a2   :  { %1255 = vmatprep.mubr.msk.bf16.mxu0 %vm1706_vm0, %v1705_v0  ;;  %1254 = vmatpush3.bf16.msra.mxu0 %v1365_v48  ;;  %v1108_v48 = vld [vmem:[#allocation19] ss:$0 sm:$0xff] }
 0x2a3   :  { %1259 = vmatprep.subr.bf16.mxu0 %v1705_v0 }
 0x374   :  { %v494_v50 = vpop.f32.mrb[0].mxu0 }
 0x375   :  { %v495_v51 = vadd.f32 %v1078_v49, %v494_v50  ;;  %v1231_v52 = vpop.f32.mrb[1].mxu0 }
 0x376   :  { %v497_v53 = vpop.f32.mrb[2].mxu0 }
 0x377   :  { %v498_v54 = vadd.f32 %v1078_v49, %v497_v53  ;;  %v1232_v55 = vpop.f32.mrb[3].mxu0  ;;  %v501_v56 = vmax.f32 %v495_v51, 0.0 }
 0x379   :  { %v502_v57 = vmax.f32 %v498_v54, 0.0 }
 0x37b   :  { %v503_v58 = vpack.c.bf16 %v502_v57, %v501_v56 }
 0x37d   :  { %1250 = vmatmul.mubr.bf16.vlgmr.msra.gmra.mrb[8].mxu1 %v503_v58 }
 0x37e   :  { %1295 = vmatprep.mubr.msk.bf16.mxu1 %vm1706_vm0, %v1705_v0  ;;  %1280 = vmatpush3.bf16.msra.mxu1 %v1374_v12 }
 0x37f   :  { %1281 = vmatprep.subr.bf16.mxu1 %v1705_v0 }
 0x382   :  { %1282 = vmatpush3.bf16.msra.mxu1 %v1375_v13 }
 0x383   :  { %1283 = vmatprep.subr.bf16.mxu1 %v1705_v0 }
 0x386   :  { %1284 = vmatpush3.bf16.msra.mxu1 %v1376_v14 }
 0x387   :  { %1285 = vmatprep.subr.bf16.mxu1 %v1705_v0 }
 0x38a   :  { %1286 = vmatpush3.bf16.msra.mxu1 %v1377_v15 }
 0x38b   :  { %1287 = vmatprep.subr.bf16.mxu1 %v1705_v0 }
 0x38e   :  { %1288 = vmatpush3.bf16.msra.mxu1 %v1378_v16 }
 0x38f   :  { %1289 = vmatprep.subr.bf16.mxu1 %v1705_v0 }
 0x392   :  { %1290 = vmatpush3.bf16.msra.mxu1 %v1379_v17 }
 0x393   :  { %1291 = vmatprep.subr.bf16.mxu1 %v1705_v0 }
 0x396   :  { %1292 = vmatpush3.bf16.msra.mxu1 %v1380_v28 }
 0x397   :  { %1293 = vmatprep.subr.bf16.mxu1 %v1705_v0 }
 0x39a   :  { %1294 = vmatpush3.bf16.msra.mxu1 %v1381_v29 }
 0x450   :  { %v609_v60 = vpop.f32.mrb[8].mxu1 }
 0x451   :  { %v610_v61 = vadd.f32 %v1087_v59, %v609_v60  ;;  %v1251_v62 = vpop.f32.mrb[9].mxu1 }
 0x452   :  { %v612_v63 = vpop.f32.mrb[10].mxu1 }
 0x453   :  { %617 = vst.msk [vmem:[#allocation21] sm:$0xff] %vm616_vm2, %v610_v61  ;;  %v613_v1 = vadd.f32 %v1087_v59, %v612_v63  ;;  %v1252_v2 = vpop.f32.mrb[11].mxu1 }
 0x455   :  { %618 = vst.msk [vmem:[#allocation21 + $0x8] sm:$0xff] %vm616_vm2, %v613_v1  ;;  %v619_v4 = vpack.c.bf16 %v613_v1, %v610_v61 }
 0x457   :  { %1256 = vmatmul.mubr.msk.bf16.vlgmr.msra.gmra.mrb[4].mxu0 %vm616_vm2, %v619_v4 }
 0x458   :  { %1260 = vmatpush3.bf16.msra.mxu0 %v1366_v3  ;;  %1275 = vmatprep.mubr.msk.bf16.mxu0 %vm1706_vm0, %v1705_v0 }
 0x459   :  { %1261 = vmatprep.subr.bf16.mxu0 %v1705_v0 }
 0x45c   :  { %1262 = vmatpush3.bf16.msra.mxu0 %v1367_v5 }
 0x45d   :  { %1263 = vmatprep.subr.bf16.mxu0 %v1705_v0 }
 0x460   :  { %1264 = vmatpush3.bf16.msra.mxu0 %v1368_v6 }
 0x461   :  { %1265 = vmatprep.subr.bf16.mxu0 %v1705_v0 }
 0x464   :  { %1266 = vmatpush3.bf16.msra.mxu0 %v1369_v7 }
 0x465   :  { %1267 = vmatprep.subr.bf16.mxu0 %v1705_v0 }
 0x468   :  { %1268 = vmatpush3.bf16.msra.mxu0 %v1370_v8 }
 0x469   :  { %1269 = vmatprep.subr.bf16.mxu0 %v1705_v0 }
 0x46c   :  { %1270 = vmatpush3.bf16.msra.mxu0 %v1371_v9 }
 0x46d   :  { %1271 = vmatprep.subr.bf16.mxu0 %v1705_v0 }
 0x470   :  { %1272 = vmatpush3.bf16.msra.mxu0 %v1372_v10 }
 0x471   :  { %1273 = vmatprep.subr.bf16.mxu0 %v1705_v0 }
 0x474   :  { %1274 = vmatpush3.bf16.msra.mxu0 %v1373_v11 }
 0x475   :  { %1299 = vmatprep.subr.bf16.mxu0 %v1705_v0 }
 0x52a   :  { %v672_v19 = vpop.f32.mrb[4].mxu0 }
 0x52b   :  { %v673_v20 = vadd.f32 %v1096_v18, %v672_v19  ;;  %v1257_v21 = vpop.f32.mrb[5].mxu0 }
 0x52c   :  { %v675_v22 = vpop.f32.mrb[6].mxu0 }
 0x52d   :  { %v676_v23 = vadd.f32 %v1096_v18, %v675_v22  ;;  %v1258_v24 = vpop.f32.mrb[7].mxu0  ;;  %v679_v25 = vmax.f32 %v673_v20, 0.0 }
 0x52f   :  { %v680_v26 = vmax.f32 %v676_v23, 0.0 }
 0x531   :  { %v681_v27 = vpack.c.bf16 %v680_v26, %v679_v25 }
 0x533   :  { %1276 = vmatmul.mubr.bf16.vlgmr.msra.gmra.mrb[8].mxu0 %v681_v27 }
 0x534   :  { %1315 = vmatprep.mubr.msk.bf16.mxu0 %vm1706_vm0, %v1705_v0  ;;  %1300 = vmatpush3.bf16.msra.mxu0 %v1382_v30 }
 0x535   :  { %1301 = vmatprep.subr.bf16.mxu0 %v1705_v0 }
 0x538   :  { %1302 = vmatpush3.bf16.msra.mxu0 %v1383_v31 }
 0x539   :  { %1303 = vmatprep.subr.bf16.mxu0 %v1705_v0 }
 0x53c   :  { %1304 = vmatpush3.bf16.msra.mxu0 %v1384_v32 }
 0x53d   :  { %1305 = vmatprep.subr.bf16.mxu0 %v1705_v0 }
 0x540   :  { %1306 = vmatpush3.bf16.msra.mxu0 %v1385_v33 }
 0x541   :  { %1307 = vmatprep.subr.bf16.mxu0 %v1705_v0 }
 0x544   :  { %1308 = vmatpush3.bf16.msra.mxu0 %v1386_v34 }
 0x545   :  { %1309 = vmatprep.subr.bf16.mxu0 %v1705_v0 }
 0x548   :  { %1310 = vmatpush3.bf16.msra.mxu0 %v1387_v35 }
 0x549   :  { %1311 = vmatprep.subr.bf16.mxu0 %v1705_v0 }
 0x54c   :  { %1312 = vmatpush3.bf16.msra.mxu0 %v1388_v46 }
 0x54d   :  { %1313 = vmatprep.subr.bf16.mxu0 %v1705_v0 }
 0x550   :  { %1314 = vmatpush3.bf16.msra.mxu0 %v1389_v47 }
 0x606   :  { %v787_v37 = vpop.f32.mrb[8].mxu0 }
 0x607   :  { %v788_v38 = vadd.f32 %v1099_v36, %v787_v37  ;;  %v1277_v39 = vpop.f32.mrb[9].mxu0 }
 0x608   :  { %v790_v40 = vpop.f32.mrb[10].mxu0 }
 0x609   :  { %v791_v41 = vadd.f32 %v1099_v36, %v790_v40  ;;  %v1278_v42 = vpop.f32.mrb[11].mxu0  ;;  %v794_v43 = vmax.f32 %v788_v38, 0.0 }
 0x60b   :  { %v795_v44 = vmax.f32 %v791_v41, 0.0 }
 0x60d   :  { %v796_v45 = vpack.c.bf16 %v795_v44, %v794_v43 }
 0x60f   :  { %1296 = vmatmul.mubr.bf16.vlgmr.msra.gmra.mrb[12].mxu1 %v796_v45 }
 0x6e2   :  { %v902_v49 = vpop.f32.mrb[12].mxu1 }
 0x6e3   :  { %v903_v50 = vadd.f32 %v1108_v48, %v902_v49  ;;  %v1297_v51 = vpop.f32.mrb[13].mxu1 }
 0x6e4   :  { %v905_v52 = vpop.f32.mrb[14].mxu1 }
 0x6e5   :  { %v906_v53 = vadd.f32 %v1108_v48, %v905_v52  ;;  %v1298_v54 = vpop.f32.mrb[15].mxu1  ;;  %v909_v55 = vmax.f32 %v903_v50, 0.0 }
 0x6e7   :  { %v910_v56 = vmax.f32 %v906_v53, 0.0 }
 0x6e9   :  { %v911_v57 = vpack.c.bf16 %v910_v56, %v909_v55 }
 0x6eb   :  { %1316 = vmatmul.mubr.bf16.vlgmr.msra.gmra.mrb[12].mxu0 %v911_v57 }
 0x6ec   :  { %1643 = shalt.err (!%p1640_p8)
}
 0x6ed   :  { %s1644_s2 = scalar_lea.hbm %s2206_s18, 256 }
 0x6ee   :  { %p1645_p9 = scmp.ne.s32.totalorder %s2206_s18, %s1644_s2  ;;  %p1648_p10 = scmp.lt.u32.totalorder %s1644_s2, %s2206_s18 }
 0x6f0   :  { %p1650_p11 = pnand %p1648_p10, %p1645_p9 }
 0x6f2   :  { %1653 = shalt.err (!%p1650_p11)
}
 0x6f3   :  { %s1708_s10 = smov 128   ;;  %s1709_s28 = smov 8   ;;  %v1117_v0 = vld [vmem:[%s2204_s16] ss:$0 sm:$0xff] }
 0x6f4   :  { %1049 = dma.vmem_to_hbm [thread:$0]  %s1044_s4, 256, %s2206_s18, [#allocation22], %s1708_s10, %s1708_s10, %s1709_s28  }
 0x6f5   :  { %s1710_s6 = smov [#allocation20]  }
 0x6f6   :  { %s1031_s24 = sshll.u32 %s1710_s6, 4  ;;  %s1032_s24 = int_to_ptr.vmem [resolvable:$true] %s1031_s24 }
 0x6f7   :  { %s1654_s29 = scalar_lea.vmem %s1032_s24, 256  ;;  %p1659_p13 = scmp.lt.s32.totalorder %s1032_s24, %s1032_s24 }
 0x6f8   :  { %p1655_p12 = scmp.ne.s32.totalorder %s1032_s24, %s1654_s29  ;;  %p1660_p0 = scmp.lt.s32.totalorder %s1654_s29, %s1654_s29 }
 0x6fa   :  { %p1661_p1 = por %p1660_p0, %p1659_p13 }
 0x6fc   :  { %p1662_p2 = pnand %p1661_p1, %p1655_p12 }
 0x7be   :  { %v1017_v58 = vpop.f32.mrb[12].mxu0 }
 0x7bf   :  { %v1018_v59 = vadd.f32 %v1117_v0, %v1017_v58  ;;  %v1317_v60 = vpop.f32.mrb[13].mxu0 }
 0x7c0   :  { %v1020_v61 = vpop.f32.mrb[14].mxu0 }
 0x7c1   :  { %1024 = vst.msk [vmem:[#allocation20] sm:$0xff] %vm226_vm1, %v1018_v59  ;;  %v1021_v62 = vadd.f32 %v1117_v0, %v1020_v61  ;;  %v1318_v63 = vpop.f32.mrb[15].mxu0 }
 0x7c3   :  { %1025 = vst.msk [vmem:[#allocation20 + $0x8] sm:$0xff] %vm226_vm1, %v1021_v62 }
 0x7c4   :  { %1665 = shalt.err (!%p1662_p2)
}
 0x7c5   :  { %s1666_s19 = scalar_lea.hbm %s2205_s17, 256 }
 0x7c6   :  { %p1667_p3 = scmp.ne.s32.totalorder %s2205_s17, %s1666_s19  ;;  %p1670_p4 = scmp.lt.u32.totalorder %s1666_s19, %s2205_s17 }
 0x7c8   :  { %p1672_p5 = pnand %p1670_p4, %p1667_p3 }
 0x7ca   :  { %1675 = shalt.err (!%p1672_p5)
}
 0x7cb   :  { %1037 = dma.vmem_to_hbm [thread:$0]  %s1032_s24, 256, %s2205_s17, [#allocation4], %s1708_s10, %s1708_s10, %s1709_s28  }
 0x7cc   :  { %1688 = dma.done.wait [#allocation4], 256  }
 0x7cd   :  { %1689 = vsyncadd [#allocation4], 4294967040 }
 0x7ce   :  { %1690 = dma.done.wait [#allocation22], 256  }
 0x7cf   :  { %1691 = vsyncadd [#allocation22], 4294967040 }
 0x7d0   :  { %1056 = vsyncpa [#allocation3], 1 }
 0x7d1   :  { %1057 = vsyncpa [#allocation6], 1 }
 0x7d2   :  { %1058 = vsyncpa [#allocation9], 1 }
 0x7d3   :  { %1059 = vsyncpa [#allocation12], 1 }
 0x7d4   :  { %1060 = vsyncpa [#allocation15], 1 }
 0x7d5   :  { %1061 = vsyncpa [#allocation18], 1 }
 0x7d6   :  { %1062 = vsyncpa [#allocation4], 1 }
 0x7d7   :  { %1063 = vsyncpa [#allocation22], 1 }

</bundles_post_ra>
